<compile_context>
chip_gen: v7x
topology: tpu7x:2x2x1
jax: 0.10.0
libtpu: 0.0.40
codegen_flags: <defaults>
</compile_context>

<pallas_src>
import jax
import jax.numpy as jnp
from jax.experimental import pallas as pl
from jax.experimental.pallas import tpu as pltpu

OUT_LANES = 128   # lane-dense packed output slab width


# ---------------------------------------------------------------------------
# Single fused kernel: conv3x3(same) -> bias -> ReLU -> GAP -> all MLP heads
# ---------------------------------------------------------------------------
def _fused_forward_kernel(pat_ref, wc_ref, bc_ref,
                          w1_ref, b1_ref, w2_ref, b2_ref,
                          wpd1_ref, bpd1_ref, wpd2_ref, bpd2_ref,
                          o_ref):
    """Whole OurModel forward in one kernel invocation.

    pat_ref  : (2B, C*9, P)   im2col patches (native NCHW layout), P = H*W
    wc_ref   : (F, C*9)       conv weight, columns ordered c*9 + kh*3 + kw
    bc_ref   : (F, 1)
    w1_ref   : (F, 3*Hd)      [cs | ct | dd] first layers packed along lanes
    b1_ref   : (1, 3*Hd)
    w2_ref   : (3*Hd, 2*ncls+2)  block-diagonal [cs | ct | dd] second layers
    b2_ref   : (1, 2*ncls+2)
    wpd1_ref : (2*ncls, 2*Hd)    prediction-discriminator layer 1, block-diag duplicated
    bpd1_ref : (1, 2*Hd)
    wpd2_ref : (2*Hd, 4)         prediction-discriminator layer 2, block-diag duplicated
    bpd2_ref : (1, 4)
    o_ref    : (2B, 128) lane-dense slab:
               [pred_s(ncls) | pred_t(ncls) | domain(2) | pd_s(2) | pd_t(2) | 0-pad]
    """
    n_img, _, p = pat_ref.shape
    n_cls = wpd1_ref.shape[0] // 2
    inv_p = jnp.float32(1.0 / p)

    wc = wc_ref[...]                       # (F, C*9)
    bc = bc_ref[...]                       # (F, 1) — lane-broadcast against (F, P)

    # conv3x3('same') as per-image transposed MXU matmuls + bias + ReLU.
    # Each chunk is (F, P) = a couple of vregs, so nothing spills between conv and GAP.
    ys = []
    for b in range(n_img):                 # static unroll; n_img = 2B is tiny
        yb = jnp.dot(wc, pat_ref[b], preferred_element_type=jnp.float32)   # (F, P)
        ys.append(jnp.maximum(yb + bc, 0.0))
    y = jnp.stack(ys, axis=0)              # (2B, F, P)

    # Global average pool: lane reduction on the XLU (no pooling matmul, no divide chain).
    feats = jnp.sum(y, axis=-1) * inv_p    # (2B, F)

    # cs | ct | dd heads: packed layer-1, block-diagonal layer-2 (2 matmuls for 3 heads).
    h = jnp.maximum(
        jnp.dot(feats, w1_ref[...], preferred_element_type=jnp.float32) + b1_ref[...],
        0.0)                                                            # (2B, 3*Hd)
    z = jnp.dot(h, w2_ref[...], preferred_element_type=jnp.float32) + b2_ref[...]
    # z columns: [pred_s(ncls) | pred_t(ncls) | domain(2)]   (GRL forward = identity)

    # Prediction discriminator once over [pred_s | pred_t] via lane-block-diagonal weights.
    pd_in = z[:, :2 * n_cls]                                            # (2B, 2*ncls)
    hp = jnp.maximum(
        jnp.dot(pd_in, wpd1_ref[...], preferred_element_type=jnp.float32) + bpd1_ref[...],
        0.0)                                                            # (2B, 2*Hd)
    pdz = jnp.dot(hp, wpd2_ref[...], preferred_element_type=jnp.float32) + bpd2_ref[...]
    # pdz columns: [pd(pred_s)(2) | pd(pred_t)(2)]

    # Assemble the slab in registers and issue ONE lane-dense store.
    pad = jnp.zeros((n_img, o_ref.shape[1] - z.shape[1] - pdz.shape[1]), jnp.float32)
    o_ref[...] = jnp.concatenate([z, pdz, pad], axis=-1)


# ---------------------------------------------------------------------------
# One-time weight packing (hoisted out of the per-call forward)
# ---------------------------------------------------------------------------
def prepare_params(params):
    fw = jnp.asarray(params["fe_w"], jnp.float32)        # (F, C, 3, 3)
    fb = jnp.asarray(params["fe_b"], jnp.float32)        # (F,)
    f_feat, c_in = fw.shape[0], fw.shape[1]

    w1_cs, b1_cs, w2_cs, b2_cs = params["cs"]
    w1_ct, b1_ct, w2_ct, b2_ct = params["ct"]
    w1_dd, b1_dd, w2_dd, b2_dd = params["dd"]
    wpd1, bpd1, wpd2, bpd2 = params["pd"]

    n_cls = w2_cs.shape[1]
    assert 2 * n_cls + 6 <= OUT_LANES, "output slab overflow: raise OUT_LANES"

    packed = dict(
        # conv weight in transposed matmul form; column order c*9 + kh*3 + kw matches
        # the channel-major patch ordering of lax.conv_general_dilated_patches (NCHW).
        wc=fw.reshape(f_feat, c_in * 9),
        bc=fb.reshape(f_feat, 1),
        # cs | ct | dd: layer-1 packed along lanes, layer-2 block-diagonal.
        w1p=jnp.concatenate([w1_cs, w1_ct, w1_dd], axis=1),
        b1p=jnp.concatenate([b1_cs, b1_ct, b1_dd], axis=1),
        w2p=jax.scipy.linalg.block_diag(w2_cs, w2_ct, w2_dd),
        b2p=jnp.concatenate([b2_cs, b2_ct, b2_dd], axis=1),
        # prediction discriminator duplicated block-diagonally so one pass handles both
        # classifier_s(features) and classifier_t(features).
        wpd1p=jax.scipy.linalg.block_diag(wpd1, wpd1),
        bpd1p=jnp.concatenate([bpd1, bpd1], axis=1),
        wpd2p=jax.scipy.linalg.block_diag(wpd2, wpd2),
        bpd2p=jnp.concatenate([bpd2, bpd2], axis=1),
    )
    return packed


# ---------------------------------------------------------------------------
# OurModel forward wrapper (one pallas_call; the rest is tiny glue)
# ---------------------------------------------------------------------------
def our_model_forward(packed, img_s, img_t, lambda_g, lambda_f):
    # GRL is the identity in the forward pass; lambda_g / lambda_f only scale gradients.
    # TODO(synk): wrap in jax.custom_vjp to implement gradient reversal (-lambda * g) for training.
    del lambda_g, lambda_f
    B = img_s.shape[0]
    imgs = jnp.concatenate([img_s, img_t], axis=0).astype(jnp.float32)   # (2B, C, H, W)
    n_img, c_in, h, w = imgs.shape
    p = h * w

    # im2col in native NCHW layout: (2B, C*9, H, W) -> (2B, C*9, P); no HBM transpose,
    # the reshape is a free collapse of the trailing spatial dims.
    pat = jax.lax.conv_general_dilated_patches(
        imgs, filter_shape=(3, 3), window_strides=(1, 1), padding="SAME")
    pat = pat.reshape(n_img, c_in * 9, p)
    # TODO(synk): for larger images, move im2col into the kernel (pltpu.roll + masks) and
    # tile the per-image conv matmul on a "parallel" grid axis (2nd TensorCore on v7x).

    n_cls = (packed["w2p"].shape[1] - 2) // 2
    operands = (pat, packed["wc"], packed["bc"], packed["w1p"], packed["b1p"],
                packed["w2p"], packed["b2p"], packed["wpd1p"], packed["bpd1p"],
                packed["wpd2p"], packed["bpd2p"])

    slab = pl.pallas_call(
        _fused_forward_kernel,
        out_shape=jax.ShapeDtypeStruct((n_img, OUT_LANES), jnp.float32),
        # No grid: whole arrays resident in VMEM with single buffers (no double-buffer
        # waste, no grid-step prologue/epilogue for a single-step "pipeline").
        in_specs=[pl.BlockSpec(memory_space=pltpu.MemorySpace.VMEM) for _ in operands],
        out_specs=pl.BlockSpec(memory_space=pltpu.MemorySpace.VMEM),
    )(*operands)

    # Unpack the slab. label_out_s/t are exact slices of pred_s/pred_t (same weights,
    # GRL is identity), so no extra classifier evaluations are needed.
    label_out_s = slab[:B, 0:n_cls]                        # classifier_s(feature_s)
    label_out_t = slab[B:n_img, n_cls:2 * n_cls]           # classifier_t(feature_t)
    domain_out = slab[:, 2 * n_cls:2 * n_cls + 2]          # domain_discriminator(features)
    prediction_out = jnp.concatenate(
        [slab[:, 2 * n_cls + 2:2 * n_cls + 4],             # pd(classifier_s(features))
         slab[:, 2 * n_cls + 4:2 * n_cls + 6]],            # pd(classifier_t(features))
        axis=0)                                            # (4B, 2)
    return label_out_s, label_out_t, domain_out, prediction_out


# ---------------------------------------------------------------------------
# Pure-JAX reference (independent of the Pallas / im2col path) for validation
# ---------------------------------------------------------------------------
def _reference_forward(params, img_s, img_t):
    hi = jax.lax.Precision.HIGHEST

    def feat(img):
        y = jax.lax.conv_general_dilated(
            img, params["fe_w"], window_strides=(1, 1), padding="SAME",
            dimension_numbers=("NCHW", "OIHW", "NCHW"), precision=hi)
        y = jnp.maximum(y + params["fe_b"][None, :, None, None], 0.0)
        return jnp.mean(y, axis=(2, 3))

    def mlp(x, p):
        w1, b1, w2, b2 = p
        h = jnp.maximum(jnp.dot(x, w1, precision=hi) + b1, 0.0)
        return jnp.dot(h, w2, precision=hi) + b2

    fs, ft = feat(img_s), feat(img_t)
    feats = jnp.concatenate([fs, ft], axis=0)
    domain_out = mlp(feats, params["dd"])                     # GRL fwd = identity
    label_out_s = mlp(fs, params["cs"])
    label_out_t = mlp(ft, params["ct"])
    preds = jnp.concatenate([mlp(feats, params["cs"]), mlp(feats, params["ct"])], axis=0)
    prediction_out = mlp(preds, params["pd"])                 # GRL fwd = identity
    return label_out_s, label_out_t, domain_out, prediction_out


# ---------------------------------------------------------------------------
# Deterministic parameter construction
# ---------------------------------------------------------------------------
def make_params(key, c_in=4, f_feat=8, hidden=32, n_cls=10):
    ks = jax.random.split(key, 18)

    def lin(ka, kb, d_in, d_out):
        w = jax.random.normal(ka, (d_in, d_out), jnp.float32) * 0.1
        b = jax.random.normal(kb, (1, d_out), jnp.float32) * 0.01
        return w, b

    return {
        "fe_w": jax.random.normal(ks[0], (f_feat, c_in, 3, 3), jnp.float32) * 0.1,
        "fe_b": jax.random.normal(ks[1], (f_feat,), jnp.float32) * 0.01,
        "cs": (*lin(ks[2], ks[3], f_feat, hidden), *lin(ks[4], ks[5], hidden, n_cls)),
        "ct": (*lin(ks[6], ks[7], f_feat, hidden), *lin(ks[8], ks[9], hidden, n_cls)),
        "dd": (*lin(ks[10], ks[11], f_feat, hidden), *lin(ks[12], ks[13], hidden, 2)),
        "pd": (*lin(ks[14], ks[15], n_cls, hidden), *lin(ks[16], ks[17], hidden, 2)),
    }


if __name__ == "__main__":
    B, C, H, W = 2, 4, 16, 16
    key = jax.random.PRNGKey(0)
    k_s, k_t, k_p = jax.random.split(key, 3)

    img_s = jax.random.normal(k_s, (B, C, H, W), jnp.float32)
    img_t = jax.random.normal(k_t, (B, C, H, W), jnp.float32)
    params = make_params(k_p)
    packed = prepare_params(params)   # one-time weight packing, outside the per-call jit

    lambda_g, lambda_f = 0.5, 0.3     # GRL is identity in forward; kept for API parity

    fwd = jax.jit(our_model_forward)
    outs = fwd(packed, img_s, img_t, lambda_g, lambda_f)
    jax.block_until_ready(outs)
    label_out_s, label_out_t, domain_out, prediction_out = outs

    assert label_out_s.shape == (B, 10)
    assert label_out_t.shape == (B, 10)
    assert domain_out.shape == (2 * B, 2)
    assert prediction_out.shape == (4 * B, 2)

    refs = _reference_forward(params, img_s, img_t)
    for got, ref in zip(outs, refs):
        assert jnp.allclose(got, ref, rtol=2e-2, atol=2e-2), \
            float(jnp.max(jnp.abs(got - ref)))

    print("KERNEL_OK")
</pallas_src>

<mosaic_0001>
module attributes {stable_mosaic.version = 11 : i64} {
  func.func @_fused_forward_kernel(%arg0: memref<4x36x256xf32, #tpu.memory_space<vmem>>, %arg1: memref<8x36xf32, #tpu.memory_space<vmem>>, %arg2: memref<8x1xf32, #tpu.memory_space<vmem>>, %arg3: memref<8x96xf32, #tpu.memory_space<vmem>>, %arg4: memref<1x96xf32, #tpu.memory_space<vmem>>, %arg5: memref<96x22xf32, #tpu.memory_space<vmem>>, %arg6: memref<1x22xf32, #tpu.memory_space<vmem>>, %arg7: memref<20x64xf32, #tpu.memory_space<vmem>>, %arg8: memref<1x64xf32, #tpu.memory_space<vmem>>, %arg9: memref<64x4xf32, #tpu.memory_space<vmem>>, %arg10: memref<1x4xf32, #tpu.memory_space<vmem>>, %arg11: memref<4x128xf32, #tpu.memory_space<vmem>>) attributes {dimension_semantics = [], scalar_prefetch = 0 : i64, scratch_operands = 0 : i64, tpu.core_type = #tpu.core_type<tc>} {
    %c0 = arith.constant 0 : index
    %c0_0 = arith.constant 0 : index
    %0 = vector.load %arg1[%c0, %c0_0] : memref<8x36xf32, #tpu.memory_space<vmem>>, vector<8x36xf32>
    %c0_1 = arith.constant 0 : index
    %c0_2 = arith.constant 0 : index
    %1 = vector.load %arg2[%c0_1, %c0_2] : memref<8x1xf32, #tpu.memory_space<vmem>>, vector<8x1xf32>
    %c0_3 = arith.constant 0 : index
    %c0_4 = arith.constant 0 : index
    %c0_5 = arith.constant 0 : index
    %2 = vector.load %arg0[%c0_3, %c0_4, %c0_5] : memref<4x36x256xf32, #tpu.memory_space<vmem>>, vector<1x36x256xf32>
    %3 = vector.shape_cast %2 : vector<1x36x256xf32> to vector<36x256xf32>
    %cst = arith.constant dense<0.000000e+00> : vector<8x256xf32>
    %4 = tpu.matmul %0, %3, %cst {dimension_numbers = #tpu.dot_dimension_numbers<[1], [0], [0], [1], [0, 0, 1, 1], [], []>} : vector<8x36xf32>, vector<36x256xf32>, vector<8x256xf32> -> vector<8x256xf32>
    %5 = vector.broadcast %1 : vector<8x1xf32> to vector<8x256xf32>
    %6 = arith.addf %4, %5 : vector<8x256xf32>
    %cst_6 = arith.constant 0.000000e+00 : f32
    %7 = vector.broadcast %cst_6 : f32 to vector<8x256xf32>
    %8 = arith.maximumf %6, %7 : vector<8x256xf32>
    %c1 = arith.constant 1 : index
    %c0_7 = arith.constant 0 : index
    %c0_8 = arith.constant 0 : index
    %9 = vector.load %arg0[%c1, %c0_7, %c0_8] : memref<4x36x256xf32, #tpu.memory_space<vmem>>, vector<1x36x256xf32>
    %10 = vector.shape_cast %9 : vector<1x36x256xf32> to vector<36x256xf32>
    %cst_9 = arith.constant dense<0.000000e+00> : vector<8x256xf32>
    %11 = tpu.matmul %0, %10, %cst_9 {dimension_numbers = #tpu.dot_dimension_numbers<[1], [0], [0], [1], [0, 0, 1, 1], [], []>} : vector<8x36xf32>, vector<36x256xf32>, vector<8x256xf32> -> vector<8x256xf32>
    %12 = vector.broadcast %1 : vector<8x1xf32> to vector<8x256xf32>
    %13 = arith.addf %11, %12 : vector<8x256xf32>
    %cst_10 = arith.constant 0.000000e+00 : f32
    %14 = vector.broadcast %cst_10 : f32 to vector<8x256xf32>
    %15 = arith.maximumf %13, %14 : vector<8x256xf32>
    %c2 = arith.constant 2 : index
    %c0_11 = arith.constant 0 : index
    %c0_12 = arith.constant 0 : index
    %16 = vector.load %arg0[%c2, %c0_11, %c0_12] : memref<4x36x256xf32, #tpu.memory_space<vmem>>, vector<1x36x256xf32>
    %17 = vector.shape_cast %16 : vector<1x36x256xf32> to vector<36x256xf32>
    %cst_13 = arith.constant dense<0.000000e+00> : vector<8x256xf32>
    %18 = tpu.matmul %0, %17, %cst_13 {dimension_numbers = #tpu.dot_dimension_numbers<[1], [0], [0], [1], [0, 0, 1, 1], [], []>} : vector<8x36xf32>, vector<36x256xf32>, vector<8x256xf32> -> vector<8x256xf32>
    %19 = vector.broadcast %1 : vector<8x1xf32> to vector<8x256xf32>
    %20 = arith.addf %18, %19 : vector<8x256xf32>
    %cst_14 = arith.constant 0.000000e+00 : f32
    %21 = vector.broadcast %cst_14 : f32 to vector<8x256xf32>
    %22 = arith.maximumf %20, %21 : vector<8x256xf32>
    %c3 = arith.constant 3 : index
    %c0_15 = arith.constant 0 : index
    %c0_16 = arith.constant 0 : index
    %23 = vector.load %arg0[%c3, %c0_15, %c0_16] : memref<4x36x256xf32, #tpu.memory_space<vmem>>, vector<1x36x256xf32>
    %24 = vector.shape_cast %23 : vector<1x36x256xf32> to vector<36x256xf32>
    %cst_17 = arith.constant dense<0.000000e+00> : vector<8x256xf32>
    %25 = tpu.matmul %0, %24, %cst_17 {dimension_numbers = #tpu.dot_dimension_numbers<[1], [0], [0], [1], [0, 0, 1, 1], [], []>} : vector<8x36xf32>, vector<36x256xf32>, vector<8x256xf32> -> vector<8x256xf32>
    %26 = vector.broadcast %1 : vector<8x1xf32> to vector<8x256xf32>
    %27 = arith.addf %25, %26 : vector<8x256xf32>
    %cst_18 = arith.constant 0.000000e+00 : f32
    %28 = vector.broadcast %cst_18 : f32 to vector<8x256xf32>
    %29 = arith.maximumf %27, %28 : vector<8x256xf32>
    %30 = vector.shape_cast %8 : vector<8x256xf32> to vector<1x8x256xf32>
    %31 = vector.shape_cast %15 : vector<8x256xf32> to vector<1x8x256xf32>
    %32 = vector.shape_cast %22 : vector<8x256xf32> to vector<1x8x256xf32>
    %33 = vector.shape_cast %29 : vector<8x256xf32> to vector<1x8x256xf32>
    %34 = tpu.concatenate %30, %31, %32, %33 in 0 : vector<1x8x256xf32>, vector<1x8x256xf32>, vector<1x8x256xf32>, vector<1x8x256xf32> -> vector<4x8x256xf32>
    %cst_19 = arith.constant dense<0.000000e+00> : vector<4x8xf32>
    %35 = vector.multi_reduction <add>, %34, %cst_19 [2] : vector<4x8x256xf32> to vector<4x8xf32>
    %cst_20 = arith.constant 3.906250e-03 : f32
    %36 = vector.broadcast %cst_20 : f32 to vector<4x8xf32>
    %37 = arith.mulf %35, %36 : vector<4x8xf32>
    %c0_21 = arith.constant 0 : index
    %c0_22 = arith.constant 0 : index
    %38 = vector.load %arg3[%c0_21, %c0_22] : memref<8x96xf32, #tpu.memory_space<vmem>>, vector<8x96xf32>
    %cst_23 = arith.constant dense<0.000000e+00> : vector<4x96xf32>
    %39 = tpu.matmul %37, %38, %cst_23 {dimension_numbers = #tpu.dot_dimension_numbers<[1], [0], [0], [1], [0, 0, 1, 1], [], []>} : vector<4x8xf32>, vector<8x96xf32>, vector<4x96xf32> -> vector<4x96xf32>
    %c0_24 = arith.constant 0 : index
    %c0_25 = arith.constant 0 : index
    %40 = vector.load %arg4[%c0_24, %c0_25] : memref<1x96xf32, #tpu.memory_space<vmem>>, vector<1x96xf32>
    %41 = vector.broadcast %40 : vector<1x96xf32> to vector<4x96xf32>
    %42 = arith.addf %39, %41 : vector<4x96xf32>
    %cst_26 = arith.constant 0.000000e+00 : f32
    %43 = vector.broadcast %cst_26 : f32 to vector<4x96xf32>
    %44 = arith.maximumf %42, %43 : vector<4x96xf32>
    %c0_27 = arith.constant 0 : index
    %c0_28 = arith.constant 0 : index
    %45 = vector.load %arg5[%c0_27, %c0_28] : memref<96x22xf32, #tpu.memory_space<vmem>>, vector<96x22xf32>
    %cst_29 = arith.constant dense<0.000000e+00> : vector<4x22xf32>
    %46 = tpu.matmul %44, %45, %cst_29 {dimension_numbers = #tpu.dot_dimension_numbers<[1], [0], [0], [1], [0, 0, 1, 1], [], []>} : vector<4x96xf32>, vector<96x22xf32>, vector<4x22xf32> -> vector<4x22xf32>
    %c0_30 = arith.constant 0 : index
    %c0_31 = arith.constant 0 : index
    %47 = vector.load %arg6[%c0_30, %c0_31] : memref<1x22xf32, #tpu.memory_space<vmem>>, vector<1x22xf32>
    %48 = vector.broadcast %47 : vector<1x22xf32> to vector<4x22xf32>
    %49 = arith.addf %46, %48 : vector<4x22xf32>
    %50 = vector.extract_strided_slice %49 {offsets = [0, 0], sizes = [4, 20], strides = [1, 1]} : vector<4x22xf32> to vector<4x20xf32>
    %c0_32 = arith.constant 0 : index
    %c0_33 = arith.constant 0 : index
    %51 = vector.load %arg7[%c0_32, %c0_33] : memref<20x64xf32, #tpu.memory_space<vmem>>, vector<20x64xf32>
    %cst_34 = arith.constant dense<0.000000e+00> : vector<4x64xf32>
    %52 = tpu.matmul %50, %51, %cst_34 {dimension_numbers = #tpu.dot_dimension_numbers<[1], [0], [0], [1], [0, 0, 1, 1], [], []>} : vector<4x20xf32>, vector<20x64xf32>, vector<4x64xf32> -> vector<4x64xf32>
    %c0_35 = arith.constant 0 : index
    %c0_36 = arith.constant 0 : index
    %53 = vector.load %arg8[%c0_35, %c0_36] : memref<1x64xf32, #tpu.memory_space<vmem>>, vector<1x64xf32>
    %54 = vector.broadcast %53 : vector<1x64xf32> to vector<4x64xf32>
    %55 = arith.addf %52, %54 : vector<4x64xf32>
    %cst_37 = arith.constant 0.000000e+00 : f32
    %56 = vector.broadcast %cst_37 : f32 to vector<4x64xf32>
    %57 = arith.maximumf %55, %56 : vector<4x64xf32>
    %c0_38 = arith.constant 0 : index
    %c0_39 = arith.constant 0 : index
    %58 = vector.load %arg9[%c0_38, %c0_39] : memref<64x4xf32, #tpu.memory_space<vmem>>, vector<64x4xf32>
    %cst_40 = arith.constant dense<0.000000e+00> : vector<4x4xf32>
    %59 = tpu.matmul %57, %58, %cst_40 {dimension_numbers = #tpu.dot_dimension_numbers<[1], [0], [0], [1], [0, 0, 1, 1], [], []>} : vector<4x64xf32>, vector<64x4xf32>, vector<4x4xf32> -> vector<4x4xf32>
    %c0_41 = arith.constant 0 : index
    %c0_42 = arith.constant 0 : index
    %60 = vector.load %arg10[%c0_41, %c0_42] : memref<1x4xf32, #tpu.memory_space<vmem>>, vector<1x4xf32>
    %61 = vector.broadcast %60 : vector<1x4xf32> to vector<4x4xf32>
    %62 = arith.addf %59, %61 : vector<4x4xf32>
    %cst_43 = arith.constant 0.000000e+00 : f32
    %63 = vector.broadcast %cst_43 : f32 to vector<4x102xf32>
    %64 = tpu.concatenate %49, %62, %63 in 1 : vector<4x22xf32>, vector<4x4xf32>, vector<4x102xf32> -> vector<4x128xf32>
    %c0_44 = arith.constant 0 : index
    %c0_45 = arith.constant 0 : index
    %65 = vector.load %arg11[%c0_44, %c0_45] : memref<4x128xf32, #tpu.memory_space<vmem>>, vector<4x128xf32>
    tpu.vector_store %arg11[%c0_44, %c0_45], %64 {strides = array<i32>} : memref<4x128xf32, #tpu.memory_space<vmem>>, vector<4x128xf32>,
    return
  }
}

</mosaic_0001>

<bundles_post_ra>
// kernel: our_model_forward.1
= control target key start
LH: loop header
LB: loop body
LE: loop exit
PB: predicated region body
PF: predicated region fallthrough
CT: control target
= control target key end

     0   :  { %v1028_v3 = vmov 0.0   ;;  %v1029_v8 = vmov 0   ;;  %vm59_vm0 = vcmask 1043456   ;;  %vm55_vm1 = vcmask 293888   ;;  %s1344_s0 = inlined_call_operand.vmem [shape: f32[4,36,256], index: 0, kind: input, shape index: {}]   ;;  %s1345_s1 = inlined_call_operand.vmem [shape: f32[8,36], index: 1, kind: input, shape index: {}]   ;;  %s1346_s2 = inlined_call_operand.vmem [shape: f32[8,1], index: 2, kind: input, shape index: {}]   ;;  %s1347_s3 = inlined_call_operand.vmem [shape: f32[8,96], index: 3, kind: input, shape index: {}]   ;;  %s1348_s5 = inlined_call_operand.vmem [shape: f32[96,22], index: 5, kind: input, shape index: {}]   ;;  %s1349_s7 = inlined_call_operand.vmem [shape: f32[20,64], index: 7, kind: input, shape index: {}]   ;;  %s1350_s4 = inlined_call_operand.vmem [shape: f32[1,96], index: 4, kind: input, shape index: {}]   ;;  %s1351_s9 = inlined_call_operand.vmem [shape: f32[64,4], index: 9, kind: input, shape index: {}]   ;;  %s1352_s6 = inlined_call_operand.vmem [shape: f32[1,22], index: 6, kind: input, shape index: {}]   ;;  %s1353_s8 = inlined_call_operand.vmem [shape: f32[1,64], index: 8, kind: input, shape index: {}]   ;;  %s1354_s10 = inlined_call_operand.vmem [shape: f32[1,4], index: 10, kind: input, shape index: {}]   ;;  %s1355_s11 = inlined_call_operand.vmem [shape: f32[4,128], index: 11, kind: output, shape index: {}]  }
   0x1   :  { %v41_v0 = vld [vmem:[%s1344_s0 + $0x8] sm:$0xff]  ;;  %v43_v1 = vld [vmem:[%s1344_s0 + $0x18] sm:$0xff]  ;;  %130 = vmatprep.mubr.f32.mxu0 %v1028_v3  ;;  %220 = vmatprep.mubr.f32.mxu1 %v1028_v3  ;;  %v40_v6 = vld [vmem:[%s1344_s0] sm:$0xff]  ;;  %vm1030_vm2 = vmmov 0   ;;  %vm455_vm3 = vcmask 1041409   ;;  %vm457_vm4 = vcmask 1042434  }
   0x2   :  { %v822_v2 = vld [vmem:[%s1344_s0 + $0x58] sm:$0xff]  ;;  %v957_v4 = vpack.c.bf16 %v43_v1, %v41_v0  ;;  %v824_v5 = vld [vmem:[%s1344_s0 + $0x68] sm:$0xff]  ;;  %v42_v7 = vld [vmem:[%s1344_s0 + $0x10] sm:$0xff]  ;;  %1027 = vset.pattern.permute.xlu0 %v1029_v8  ;;  %vm459_vm5 = vcmask 1043459   ;;  %vm461_vm6 = vcmask 64512   ;;  %vm554_vm7 = vcmask 785408  }
   0x3   :  { %v965_v9 = vpack.c.bf16 %v824_v5, %v822_v2  ;;  %v959_v10 = vpack.c.bf16 %v42_v7, %v40_v6  ;;  %v821_v11 = vld [vmem:[%s1344_s0 + $0x50] sm:$0xff]  ;;  %v823_v12 = vld [vmem:[%s1344_s0 + $0x60] sm:$0xff]  ;;  %v45_v13 = vld [vmem:[%s1344_s0 + $0x28] sm:$0xff]  ;;  %vm638_vm8 = vcmask 162816   ;;  %vm731_vm9 = vcmask 523264  }
   0x4   :  { %958 = vmatprep.subr.bf16.mxu0 %v957_v4  ;;  %v967_v14 = vpack.c.bf16 %v823_v12, %v821_v11  ;;  %v47_v15 = vld [vmem:[%s1344_s0 + $0x38] sm:$0xff]  ;;  %v828_v17 = vld [vmem:[%s1344_s0 + $0x88] sm:$0xff]  ;;  %v44_v20 = vld [vmem:[%s1344_s0 + $0x20] sm:$0xff]  ;;  %vm809_vm10 = vcmask 179200   ;;  %vm811_vm11 = vcmask 211968  }
   0x5   :  { %v826_v16 = vld [vmem:[%s1344_s0 + $0x78] sm:$0xff]  ;;  %966 = vmatprep.subr.bf16.mxu1 %v965_v9  ;;  %960 = vmatpush1.bf16.msra.mxu0 %v959_v10  ;;  %v961_v18 = vpack.c.bf16 %v47_v15, %v45_v13  ;;  %v46_v21 = vld [vmem:[%s1344_s0 + $0x30] sm:$0xff]  ;;  %v827_v24 = vld [vmem:[%s1344_s0 + $0x80] sm:$0xff] }
   0x6   :  { %v969_v19 = vpack.c.bf16 %v828_v17, %v826_v16  ;;  %v825_v22 = vld [vmem:[%s1344_s0 + $0x70] sm:$0xff]  ;;  %968 = vmatpush1.bf16.msra.mxu1 %v967_v14  ;;  %v963_v23 = vpack.c.bf16 %v46_v21, %v44_v20  ;;  %v49_v26 = vld [vmem:[%s1344_s0 + $0x48] sm:$0xf]  ;;  %v830_v27 = vld [vmem:[%s1344_s0 + $0x98] sm:$0xf] }
   0x7   :  { %962 = vmatprep.subr.bf16.mxu0 %v961_v18  ;;  %v971_v25 = vpack.c.bf16 %v827_v24, %v825_v22  ;;  %v48_v28 = vld [vmem:[%s1344_s0 + $0x40] sm:$0xf]  ;;  %v835_v29 = vld [vmem:[%s1344_s0 + $0xa8] sm:$0xff]  ;;  %v837_v30 = vld [vmem:[%s1344_s0 + $0xb8] sm:$0xff] }
   0x8   :  { %970 = vmatprep.subr.bf16.mxu1 %v969_v19  ;;  %v848_v31 = vld [vmem:[%s1344_s0 + $0xf8] sm:$0xff]  ;;  %v829_v32 = vld [vmem:[%s1344_s0 + $0x90] sm:$0xf]  ;;  %v38_v33 = vld [vmem:[%s1345_s1] sm:$0xff]  ;;  %v973_v40 = vpack.c.bf16 %v837_v30, %v835_v29 }
   0x9   :  { %964 = vmatpush1.bf16.msra.mxu0 %v963_v23  ;;  %v850_v34 = vld [vmem:[%s1344_s0 + $0x108] sm:$0xff]  ;;  %v834_v35 = vld [vmem:[%s1344_s0 + $0xa0] sm:$0xff]  ;;  %v836_v36 = vld [vmem:[%s1344_s0 + $0xb0] sm:$0xff] }
   0xa   :  { %972 = vmatpush1.bf16.msra.mxu1 %v971_v25  ;;  %818 = vmatprep.subr.msk.mxu0 %vm59_vm0, %v49_v26  ;;  %v847_v37 = vld [vmem:[%s1344_s0 + $0xf0] sm:$0xff]  ;;  %v849_v38 = vld [vmem:[%s1344_s0 + $0x100] sm:$0xff]  ;;  %v839_v39 = vld [vmem:[%s1344_s0 + $0xc8] sm:$0xff]  ;;  %v981_v44 = vpack.c.bf16 %v850_v34, %v848_v31  ;;  %v975_v45 = vpack.c.bf16 %v836_v36, %v834_v35 }
   0xb   :  { %831 = vmatprep.subr.msk.mxu1 %vm59_vm0, %v830_v27  ;;  %v841_v41 = vld [vmem:[%s1344_s0 + $0xd8] sm:$0xff]  ;;  %v854_v43 = vld [vmem:[%s1344_s0 + $0x128] sm:$0xff]  ;;  %v983_v46 = vpack.c.bf16 %v849_v38, %v847_v37  ;;  %v838_v48 = vld [vmem:[%s1344_s0 + $0xc0] sm:$0xff]  ;;  %v1031_v27 = vmov 0.0|0.0  }
   0xc   :  { %v852_v42 = vld [vmem:[%s1344_s0 + $0x118] sm:$0xff]  ;;  %v977_v47 = vpack.c.bf16 %v841_v41, %v839_v39  ;;  %v840_v49 = vld [vmem:[%s1344_s0 + $0xd0] sm:$0xff]  ;;  %v853_v52 = vld [vmem:[%s1344_s0 + $0x120] sm:$0xff] }
   0xd   :  { %819 = vmatpush1.msk.msra.mxu0 %vm59_vm0, %v48_v28  ;;  %v985_v50 = vpack.c.bf16 %v854_v43, %v852_v42  ;;  %v851_v51 = vld [vmem:[%s1344_s0 + $0x110] sm:$0xff]  ;;  %v979_v53 = vpack.c.bf16 %v840_v49, %v838_v48  ;;  %v39_v54 = vld [vmem:[%s1346_s2] sm:$0xff]  ;;  %v843_v56 = vld [vmem:[%s1344_s0 + $0xe8] sm:$0xf]  ;;  %v437_v43 = vlaneseq }
   0xe   :  { %832 = vmatpush1.msk.msra.mxu1 %vm59_vm0, %v829_v32  ;;  %820 = vmatmul.mubr.msk.f32.vlgmr.msra.gmra.mrb[0].mxu0 %vm55_vm1, %v38_v33  ;;  %v987_v55 = vpack.c.bf16 %v853_v52, %v851_v51  ;;  %v856_v57 = vld [vmem:[%s1344_s0 + $0x138] sm:$0xf]  ;;  %v842_v58 = vld [vmem:[%s1344_s0 + $0xe0] sm:$0xf]  ;;  %v855_v59 = vld [vmem:[%s1344_s0 + $0x130] sm:$0xf] }
   0xf   :  { %833 = vmatmul.mubr.msk.f32.vlgmr.msra.gmra.mrb[0].mxu1 %vm55_vm1, %v38_v33  ;;  %974 = vmatprep.subr.bf16.mxu0 %v973_v40  ;;  %v425_v26 = vld [vmem:[%s1347_s3] sm:$0xff]  ;;  %v536_v29 = vld [vmem:[%s1348_s5 + $0x8] sm:$0xff]  ;;  %v537_v30 = vld [vmem:[%s1348_s5 + $0x10] sm:$0xff] }
  0x10   :  { %982 = vmatprep.subr.bf16.mxu1 %v981_v44  ;;  %976 = vmatpush1.bf16.msra.mxu0 %v975_v45  ;;  %v535_v28 = vld [vmem:[%s1348_s5] sm:$0xff]  ;;  %v538_v32 = vld [vmem:[%s1348_s5 + $0x18] sm:$0xff]  ;;  %v540_v35 = vld [vmem:[%s1348_s5 + $0x28] sm:$0xff]  ;;  %v438_v44 = vand.u32 127, %v437_v43  ;;  %v440_v45 = vshrl.u32 %v437_v43, 7 }
  0x11   :  { %984 = vmatpush1.bf16.msra.mxu1 %v983_v46  ;;  %978 = vmatprep.subr.bf16.mxu0 %v977_v47  ;;  %v990_v31 = vpack.c.bf16 %v536_v29, %v535_v28  ;;  %v539_v34 = vld [vmem:[%s1348_s5 + $0x20] sm:$0xff]  ;;  %v541_v37 = vld [vmem:[%s1348_s5 + $0x30] sm:$0xff]  ;;  %v542_v38 = vld [vmem:[%s1348_s5 + $0x38] sm:$0xff] }
  0x12   :  { %986 = vmatprep.subr.bf16.mxu1 %v985_v50  ;;  %310 = vmatprep.mubr.f32.mxu0 %v1028_v3  ;;  %v996_v36 = vpack.c.bf16 %v540_v35, %v539_v34  ;;  %v999_v39 = vpack.c.bf16 %v542_v38, %v541_v37  ;;  %v543_v40 = vld [vmem:[%s1348_s5 + $0x40] sm:$0xff]  ;;  %v544_v41 = vld [vmem:[%s1348_s5 + $0x48] sm:$0xff]  ;;  %v441_v48 = vsub.s32 %v438_v44, %v440_v45 }
  0x13   :  { %400 = vmatprep.mubr.f32.mxu1 %v1028_v3  ;;  %52 = vperm.xlu0 %1027, %v39_v54   ;;  %v1002_v42 = vpack.c.bf16 %v544_v41, %v543_v40 }
  0x14   :  { %980 = vmatpush1.bf16.msra.mxu0 %v979_v53 }
  0x15   :  { %988 = vmatpush1.bf16.msra.mxu1 %v987_v55  ;;  %844 = vmatprep.subr.msk.mxu0 %vm59_vm0, %v843_v56 }
  0x16   :  { %857 = vmatprep.subr.msk.mxu1 %vm59_vm0, %v856_v57 }
  0x18   :  { %845 = vmatpush1.msk.msra.mxu0 %vm59_vm0, %v842_v58 }
  0x19   :  { %858 = vmatpush1.msk.msra.mxu1 %vm59_vm0, %v855_v59  ;;  %846 = vmatmul.mubr.msk.f32.vlgmr.msra.gmra.mrb[2].mxu0 %vm55_vm1, %v38_v33 }
  0x1a   :  { %859 = vmatmul.mubr.msk.f32.vlgmr.msra.gmra.mrb[2].mxu1 %vm55_vm1, %v38_v33  ;;  %897 = vmatprep.subr.mxu0 %v1028_v3  ;;  %v993_v33 = vpack.c.bf16 %v538_v32, %v537_v30 }
  0x1b   :  { %899 = vmatprep.mubr.msk.f32.mxu0 %vm1030_vm2, %v1028_v3  ;;  %926 = vmatprep.mubr.msk.f32.mxu1 %vm1030_vm2, %v1028_v3 }
  0x1c   :  { %898 = vmatpush3.msra.mxu0 %v425_v26  ;;  %989 = vmatprep.subr.bf16.mxu1 %v1031_v27  ;;  %v864_v26 = vld [vmem:[%s1353_s8] ss:$0 sm:$0xff] }
  0x1d   :  { %1007 = vmatprep.subr.bf16.mxu0 %v1031_v27  ;;  %991 = vmatpush3.bf16.msra.mxu1 %v990_v31 }
  0x1e   :  { %992 = vmatprep.subr.bf16.mxu1 %v1031_v27 }
  0x21   :  { %994 = vmatpush3.bf16.msra.mxu1 %v993_v33 }
  0x22   :  { %995 = vmatprep.subr.bf16.mxu1 %v1031_v27 }
  0x25   :  { %997 = vmatpush3.bf16.msra.mxu1 %v996_v36 }
  0x26   :  { %998 = vmatprep.subr.bf16.mxu1 %v1031_v27 }
  0x29   :  { %1000 = vmatpush3.bf16.msra.mxu1 %v999_v39 }
  0x2a   :  { %1001 = vmatprep.subr.bf16.mxu1 %v1031_v27 }
  0x2d   :  { %1003 = vmatpush3.bf16.msra.mxu1 %v1002_v42 }
  0x2e   :  { %1004 = vmatprep.subr.bf16.mxu1 %v1031_v27 }
  0x92   :  { %v53_v60 = vpop.permute.xlu0 %52 }
  0xe1   :  { %v132_v61 = vpop.f32.mrb[0].mxu0 }
  0xe2   :  { %v222_v62 = vpop.f32.mrb[0].mxu1  ;;  %v134_v63 = vpop.f32.mrb[1].mxu0  ;;  %v133_v0 = vadd.f32 %v132_v61, %v53_v60 }
  0xe3   :  { %v135_v1 = vadd.f32 %v134_v63, %v53_v60  ;;  %v224_v2 = vpop.f32.mrb[1].mxu1  ;;  %v223_v4 = vadd.f32 %v222_v62, %v53_v60  ;;  %v545_v62 = vld [vmem:[%s1348_s5 + $0x50] sm:$0xff]  ;;  %v546_v63 = vld [vmem:[%s1348_s5 + $0x58] sm:$0xff] }
  0xe4   :  { %v225_v5 = vadd.f32 %v224_v2, %v53_v60  ;;  %v137_v6 = vmax.f32 %v133_v0, 0.0  ;;  %v1005_v0 = vpack.c.bf16 %v546_v63, %v545_v62  ;;  %v629_v2 = vld [vmem:[%s1349_s7 + $0x8] sm:$0xff] }
  0xe5   :  { %v138_v7 = vmax.f32 %v135_v1, 0.0  ;;  %v227_v8 = vmax.f32 %v223_v4, 0.0  ;;  %v628_v1 = vld [vmem:[%s1349_s7] sm:$0xff] }
  0xe6   :  { %v228_v9 = vmax.f32 %v225_v5, 0.0  ;;  %1006 = vmatpush3.bf16.msra.mxu1 %v1005_v0  ;;  %v1008_v4 = vpack.c.bf16 %v629_v2, %v628_v1  ;;  %v860_v5 = vld [vmem:[%s1350_s4] ss:$0 sm:$0xff] }
  0xe7   :  { %v409_v10 = vadd.f32 %v138_v7, %v137_v6 }
  0xe8   :  { %v412_v11 = vadd.f32 %v228_v9, %v227_v8 }
  0xe9   :  { %410 = vadd.xlane.f32.xlu0 %v409_v10  ;;  %v630_v10 = vld [vmem:[%s1349_s7 + $0x10] sm:$0xf] }
  0xea   :  { %413 = vadd.xlane.f32.xlu1 %v412_v11  ;;  %v716_v11 = vld [vmem:[%s1351_s9] sm:$0xff] }
  0xec   :  { %v312_v12 = vpop.f32.mrb[2].mxu0 }
  0xed   :  { %v313_v13 = vadd.f32 %v312_v12, %v53_v60  ;;  %v402_v14 = vpop.f32.mrb[2].mxu1  ;;  %v314_v15 = vpop.f32.mrb[3].mxu0  ;;  %v717_v12 = vld [vmem:[%s1351_s9 + $0x8] sm:$0xff] }
  0xee   :  { %v403_v16 = vadd.f32 %v402_v14, %v53_v60  ;;  %v315_v17 = vadd.f32 %v314_v15, %v53_v60  ;;  %v404_v18 = vpop.f32.mrb[3].mxu1  ;;  %v1011_v15 = vpack.c.bf16 %v717_v12, %v716_v11 }
  0xef   :  { %v317_v19 = vmax.f32 %v313_v13, 0.0  ;;  %v405_v20 = vadd.f32 %v404_v18, %v53_v60  ;;  %v862_v13 = vld [vmem:[%s1352_s6] ss:$0 sm:$0xff]  ;;  %v718_v18 = vld [vmem:[%s1351_s9 + $0x10] sm:$0xff] }
  0xf0   :  { %v407_v21 = vmax.f32 %v403_v16, 0.0  ;;  %v318_v22 = vmax.f32 %v315_v17, 0.0 }
  0xf1   :  { %v408_v23 = vmax.f32 %v405_v20, 0.0 }
  0xf2   :  { %v415_v24 = vadd.f32 %v318_v22, %v317_v19  ;;  %v719_v19 = vld [vmem:[%s1351_s9 + $0x18] sm:$0xff]  ;;  %v721_v22 = vld [vmem:[%s1351_s9 + $0x28] sm:$0xff] }
  0xf3   :  { %v418_v25 = vadd.f32 %v408_v23, %v407_v21  ;;  %v1014_v20 = vpack.c.bf16 %v719_v19, %v718_v18  ;;  %v720_v21 = vld [vmem:[%s1351_s9 + $0x20] sm:$0xff] }
  0xf4   :  { %416 = vadd.xlane.f32.xlu1 %v415_v24  ;;  %v1017_v23 = vpack.c.bf16 %v721_v22, %v720_v21  ;;  %v723_v24 = vld [vmem:[%s1351_s9 + $0x38] sm:$0xff] }
  0xf8   :  { %419 = vadd.xlane.f32.xlu1 %v418_v25 }
 0x176   :  { %v411_v47 = vpop.xlane.xlu0 %410 }
 0x177   :  { %v414_v46 = vpop.xlane.xlu1 %413  ;;  %v421_v50 = vmul.f32 0.00390625, %v411_v47 }
 0x178   :  { %v422_v49 = vmul.f32 0.00390625, %v414_v46 }
 0x179   :  { %v442_v54 = vrot.slane %v421_v50, %v441_v48 }
 0x17a   :  { %v446_v53 = vrot.slane %v422_v49, %v441_v48 }
 0x17c   :  { %v456_v58 = vsel %vm455_vm3, %v446_v53, %v442_v54 }
 0x181   :  { %v417_v51 = vpop.xlane.xlu1 %416 }
 0x182   :  { %v423_v52 = vmul.f32 0.00390625, %v417_v51 }
 0x184   :  { %v450_v55 = vrot.slane %v423_v52, %v441_v48 }
 0x185   :  { %v420_v56 = vpop.xlane.xlu1 %419 }
 0x186   :  { %v424_v57 = vmul.f32 0.00390625, %v420_v56  ;;  %v458_v60 = vsel %vm457_vm4, %v450_v55, %v456_v58 }
 0x188   :  { %v454_v59 = vrot.slane %v424_v57, %v441_v48 }
 0x18a   :  { %v460_v61 = vsel %vm459_vm5, %v454_v59, %v458_v60 }
 0x18b   :  { %900 = vmatmul.mubr.msk.f32.vlgmr.msra.gmra.mrb[4].mxu0 %vm461_vm6, %v460_v61 }
 0x18c   :  { %935 = vmatprep.mubr.msk.f32.mxu0 %vm1030_vm2, %v1028_v3  ;;  %1009 = vmatpush3.bf16.msra.mxu0 %v1008_v4 }
 0x18d   :  { %933 = vmatprep.subr.mxu0 %v1028_v3 }
 0x190   :  { %934 = vmatpush3.msk.msra.mxu0 %vm59_vm0, %v630_v10 }
 0x191   :  { %1010 = vmatprep.subr.bf16.mxu0 %v1031_v27 }
 0x25e   :  { %v530_v6 = vpop.f32.mrb[4].mxu0 }
 0x25f   :  { %v531_v7 = vadd.f32 %v860_v5, %v530_v6  ;;  %v901_v8 = vpop.f32.mrb[5].mxu0 }
 0x261   :  { %v534_v9 = vmax.f32 %v531_v7, 0.0 }
 0x263   :  { %927 = vmatmul.mubr.msk.f32.vlgmr.msra.gmra.mrb[4].mxu1 %vm554_vm7, %v534_v9 }
 0x336   :  { %v624_v14 = vpop.f32.mrb[4].mxu1 }
 0x337   :  { %v625_v16 = vadd.f32 %v862_v13, %v624_v14  ;;  %v928_v17 = vpop.f32.mrb[5].mxu1 }
 0x339   :  { %936 = vmatmul.mubr.msk.f32.vlgmr.msra.gmra.mrb[6].mxu0 %vm638_vm8, %v625_v16 }
 0x33a   :  { %1012 = vmatpush3.bf16.msra.mxu0 %v1011_v15  ;;  %954 = vmatprep.mubr.msk.f32.mxu0 %vm1030_vm2, %v1028_v3  ;;  %v722_v3 = vld [vmem:[%s1351_s9 + $0x30] sm:$0xff]  ;;  %s1032_s9 = smov 22  }
 0x33b   :  { %1013 = vmatprep.subr.bf16.mxu0 %v1031_v27  ;;  %v1020_v25 = vpack.c.bf16 %v723_v24, %v722_v3 }
 0x33e   :  { %1015 = vmatpush3.bf16.msra.mxu0 %v1014_v20 }
 0x33f   :  { %1016 = vmatprep.subr.bf16.mxu0 %v1031_v27 }
 0x342   :  { %1018 = vmatpush3.bf16.msra.mxu0 %v1017_v23 }
 0x343   :  { %1019 = vmatprep.subr.bf16.mxu0 %v1031_v27  ;;  %v867_v27 = vld [vmem:[%s1354_s10] ss:$0 sm:$0xff] }
 0x346   :  { %1021 = vmatpush3.bf16.msra.mxu0 %v1020_v25 }
 0x40c   :  { %v711_v28 = vpop.f32.mrb[6].mxu0 }
 0x40d   :  { %v712_v29 = vadd.f32 %v864_v26, %v711_v28  ;;  %v937_v30 = vpop.f32.mrb[7].mxu0 }
 0x40f   :  { %v715_v31 = vmax.f32 %v712_v29, 0.0 }
 0x411   :  { %955 = vmatmul.mubr.msk.f32.vlgmr.msra.gmra.mrb[8].mxu0 %vm731_vm9, %v715_v31 }
 0x4e4   :  { %v801_v32 = vpop.f32.mrb[8].mxu0 }
 0x4e5   :  { %v802_v33 = vadd.f32 %v867_v27, %v801_v32  ;;  %v956_v34 = vpop.f32.mrb[9].mxu0 }
 0x4e7   :  { %806 = vrot.lane.b32.xlu1 %v802_v33, %s1032_s9 }
 0x559   :  { %v807_v35 = vpop.permute.xlu1 %806 }
 0x55a   :  { %v810_v36 = vsel %vm809_vm10, %v625_v16, %v807_v35 }
 0x55b   :  { %v812_v37 = vsel %vm811_vm11, %v810_v36, 0.0 }
 0x55c   :  { %813 = vst [vmem:[%s1355_s11] sm:$0xf] %v812_v37 }

</bundles_post_ra>
